<compile_context>
chip_gen: v7x
topology: tpu7x:2x2x1
jax: 0.10.0
libtpu: 0.0.40
codegen_flags: <defaults>
</compile_context>

<pallas_src>
import functools

import jax
import jax.numpy as jnp
from jax import lax
from jax.experimental import pallas as pl
from jax.experimental.pallas import tpu as pltpu

_NEG = -1e30  # finite "-inf" used to mask padded log_softmax lanes


# ----------------------------------------------------------------------------
# Kernel 1: feature transform  XW = X @ W   (computed ONCE per layer)
# ----------------------------------------------------------------------------
def _xw_kernel(x_ref, w_ref, xw_ref, acc_ref):
    k = pl.program_id(1)

    @pl.when(k == 0)
    def _init():
        acc_ref[...] = jnp.zeros_like(acc_ref)

    acc_ref[...] += jnp.dot(x_ref[...], w_ref[...],
                            preferred_element_type=jnp.float32)

    @pl.when(k == pl.num_programs(1) - 1)
    def _finalize():
        xw_ref[...] = acc_ref[...].astype(xw_ref.dtype)


def _feature_transform(x_p, w_p, *, tile_m, tile_k):
    """XW = X @ W, bf16 operands, f32 accumulate, bf16 output."""
    n_p, f_p = x_p.shape
    c_p = w_p.shape[1]
    assert n_p % tile_m == 0 and f_p % tile_k == 0
    grid = (n_p // tile_m, f_p // tile_k)

    flops = 2 * n_p * f_p * c_p
    bytes_accessed = n_p * f_p * 2 + grid[0] * f_p * c_p * 2 + n_p * c_p * 2

    return pl.pallas_call(
        _xw_kernel,
        out_shape=jax.ShapeDtypeStruct((n_p, c_p), jnp.bfloat16),
        grid_spec=pltpu.PrefetchScalarGridSpec(
            num_scalar_prefetch=0,
            grid=grid,
            in_specs=[
                pl.BlockSpec((tile_m, tile_k), lambda i, k: (i, k)),  # X tile
                pl.BlockSpec((tile_k, c_p), lambda i, k: (k, 0)),     # W tile
            ],
            out_specs=pl.BlockSpec((tile_m, c_p), lambda i, k: (i, 0)),
            scratch_shapes=[pltpu.VMEM((tile_m, c_p), jnp.float32)],
        ),
        compiler_params=pltpu.CompilerParams(
            dimension_semantics=("parallel", "arbitrary"),
            vmem_limit_bytes=48 * 1024 * 1024,
        ),
        cost_estimate=pl.CostEstimate(flops=int(flops),
                                      transcendentals=0,
                                      bytes_accessed=int(bytes_accessed)),
    )(x_p, w_p)


# ----------------------------------------------------------------------------
# Kernel 2: aggregation + epilogue   out = act(A_hat @ XW + b)
# ----------------------------------------------------------------------------
def _agg_kernel(a_ref, xw_ref, b_ref, out_ref, acc_ref, *,
                activation, valid_cols):
    k = pl.program_id(1)

    @pl.when(k == 0)
    def _init():
        acc_ref[...] = jnp.zeros_like(acc_ref)

    # Only the N^2 adjacency stream and the (already transformed) XW rows are
    # touched here — no per-step X@W recompute, no bf16 repack.
    acc_ref[...] += jnp.dot(a_ref[...], xw_ref[...],
                            preferred_element_type=jnp.float32)

    @pl.when(k == pl.num_programs(1) - 1)
    def _finalize():
        z = acc_ref[...] + b_ref[...]
        if activation == "relu":
            out_ref[...] = jnp.maximum(z, 0.0).astype(out_ref.dtype)
        else:
            # log_softmax over the feature axis; padded lanes must NOT leak
            # into the max / normalizer, so mask them to a huge negative.
            col = lax.broadcasted_iota(jnp.int32, z.shape, 1)
            zm = jnp.where(col < valid_cols, z, _NEG)
            m = jnp.max(zm, axis=1, keepdims=True)
            s = zm - m
            lse = jnp.log(jnp.sum(jnp.exp(s), axis=1, keepdims=True))
            out_ref[...] = (s - lse).astype(out_ref.dtype)


def _aggregate(a_p, xw_p, b_p, *, activation, valid_cols, out_dtype,
               tile_m, tile_k):
    """act(A_hat @ XW + b). XW already computed once by _feature_transform."""
    n_p = a_p.shape[0]
    c_p = xw_p.shape[1]
    assert n_p % tile_m == 0 and n_p % tile_k == 0
    grid = (n_p // tile_m, n_p // tile_k)

    kernel = functools.partial(_agg_kernel, activation=activation,
                               valid_cols=valid_cols)

    flops = 2 * n_p * n_p * c_p
    transcendentals = n_p * c_p if activation == "log_softmax" else 0
    bytes_accessed = (n_p * n_p * 2                 # a_hat (bf16), dominant
                      + grid[0] * n_p * c_p * 2     # XW rows, re-read per row block
                      + c_p * 4                     # bias
                      + n_p * c_p * jnp.dtype(out_dtype).itemsize)

    # TODO(synk): block-sparse aggregation — use num_scalar_prefetch>=1 to
    # prefetch per-row-block lists of nonzero adjacency column blocks, drive
    # the a_hat/XW index_maps and k extent from them, and skip all-zero A
    # tiles (O(E) instead of O(N^2) work for real sparse graphs).
    # TODO(synk): v5e — pipeline_mode=pl.Buffered(3) on the a_hat spec to hide
    # DMA latency on the HBM-bound N^2 stream.
    # TODO(synk): v7x — store A_hat in fp8 (values in [0,1]) to halve the
    # dominant N^2 HBM stream.
    # TODO(synk): if c_p ever exceeds 256, add an output-column grid axis
    # instead of widening the accumulator / output block.
    return pl.pallas_call(
        kernel,
        out_shape=jax.ShapeDtypeStruct((n_p, c_p), out_dtype),
        grid_spec=pltpu.PrefetchScalarGridSpec(
            num_scalar_prefetch=0,
            grid=grid,
            in_specs=[
                pl.BlockSpec((tile_m, tile_k), lambda i, k: (i, k)),  # a_hat tile
                pl.BlockSpec((tile_k, c_p), lambda i, k: (k, 0)),     # XW rows of k
                pl.BlockSpec((1, c_p), lambda i, k: (0, 0)),          # bias
            ],
            out_specs=pl.BlockSpec((tile_m, c_p), lambda i, k: (i, 0)),
            scratch_shapes=[pltpu.VMEM((tile_m, c_p), jnp.float32)],
        ),
        compiler_params=pltpu.CompilerParams(
            dimension_semantics=("parallel", "arbitrary"),
            vmem_limit_bytes=48 * 1024 * 1024,
        ),
        cost_estimate=pl.CostEstimate(flops=int(flops),
                                      transcendentals=int(transcendentals),
                                      bytes_accessed=int(bytes_accessed)),
    )(a_p, xw_p, b_p)


def _gcn_layer(a_p, x_p, w_p, b_p, *, activation, valid_cols, out_dtype,
               tile_m, tile_k_feat, tile_k_nodes):
    """One GCN layer: act(A_hat @ (X @ W) + b), with X@W hoisted & computed once."""
    xw = _feature_transform(x_p, w_p, tile_m=tile_m, tile_k=tile_k_feat)
    return _aggregate(a_p, xw, b_p, activation=activation,
                      valid_cols=valid_cols, out_dtype=out_dtype,
                      tile_m=tile_m, tile_k=tile_k_nodes)


# ----------------------------------------------------------------------------
# Host-side glue
# ----------------------------------------------------------------------------
def _round_up(v, m):
    return (v + m - 1) // m * m


def _pick_tile(dim, cap=512):
    """Largest 128-multiple <= cap that divides dim (dim is a 128-multiple)."""
    for t in (512, 384, 256, 128):
        if t <= cap and dim % t == 0:
            return t
    return 128


def _pad2d(x, rows, cols):
    r, c = x.shape
    return jnp.pad(x, ((0, rows - r), (0, cols - c)))


def my_gcn_forward(x, a_hat, w1, b1, w2, b2):
    """log_softmax(A @ relu(A @ (X@W1) + b1) @ W2 + b2) over the feature axis."""
    n, f_in = x.shape
    hid = w1.shape[1]
    out_dim = w2.shape[1]

    n_p = _round_up(n, 128)
    f_p = _round_up(f_in, 128)
    h_p = _round_up(hid, 128)
    o_p = _round_up(out_dim, 128)

    # 256-512 tiles: ~85% of HBM roofline, full MXU width on v6e/v7x; row-block
    # count is a "parallel" axis so it shards across the two v7x TensorCores.
    tile_m = _pick_tile(n_p)
    tile_kn = _pick_tile(n_p)
    tile_kf = _pick_tile(f_p)
    tile_kh = _pick_tile(h_p)

    a_p = _pad2d(a_hat, n_p, n_p).astype(jnp.bfloat16)
    x_p = _pad2d(x, n_p, f_p).astype(jnp.bfloat16)
    w1_p = _pad2d(w1, f_p, h_p).astype(jnp.bfloat16)
    w2_p = _pad2d(w2, h_p, o_p).astype(jnp.bfloat16)
    b1_p = _pad2d(b1.reshape(1, hid), 1, h_p).astype(jnp.float32)
    b2_p = _pad2d(b2.reshape(1, out_dim), 1, o_p).astype(jnp.float32)

    # Layer 1: ReLU(A @ (X @ W1) + b1) -> bf16 hidden features (halves HBM
    # traffic into layer 2, feeds the MXU bf16).
    h = _gcn_layer(a_p, x_p, w1_p, b1_p, activation="relu",
                   valid_cols=hid, out_dtype=jnp.bfloat16,
                   tile_m=tile_m, tile_k_feat=tile_kf, tile_k_nodes=tile_kn)

    # TODO(synk): training-mode dropout would use pltpu.prng_seed /
    # prng_random_bits; eval-mode dropout (module.eval()) is the identity.

    # Layer 2: log_softmax(A @ (H @ W2) + b2, dim=1), padded lanes masked.
    z = _gcn_layer(a_p, h, w2_p, b2_p, activation="log_softmax",
                   valid_cols=out_dim, out_dtype=jnp.float32,
                   tile_m=tile_m, tile_k_feat=tile_kh, tile_k_nodes=tile_kn)

    return z[:n, :out_dim]


def build_normalized_adjacency(edge_index, num_nodes):
    """Dense D^-1/2 (A + I) D^-1/2 matching PyG GCNConv's gcn_norm."""
    src = edge_index[0]
    dst = edge_index[1]
    a = jnp.zeros((num_nodes, num_nodes), jnp.float32)
    a = a.at[dst, src].add(1.0)                      # edge j -> i
    a = a + jnp.eye(num_nodes, dtype=jnp.float32)    # self-loops
    deg = jnp.sum(a, axis=1)
    d_inv_sqrt = jnp.where(deg > 0, 1.0 / jnp.sqrt(deg), 0.0)
    return d_inv_sqrt[:, None] * a * d_inv_sqrt[None, :]


def glorot(key, shape):
    fan_in, fan_out = shape
    limit = jnp.sqrt(6.0 / (fan_in + fan_out))
    return jax.random.uniform(key, shape, jnp.float32, -limit, limit)


if __name__ == "__main__":
    # Small shapes consistent with the module.
    N, input_dim, hidden_dim, output_dim = 8, 16, 32, 8

    key = jax.random.PRNGKey(0)
    kx, kw1, kw2 = jax.random.split(key, 3)

    x = jax.random.normal(kx, (N, input_dim), jnp.float32)

    # Undirected ring graph stored as directed edges both ways: edge_index [2, E]
    ring = jnp.arange(N)
    src = jnp.concatenate([ring, (ring + 1) % N])
    dst = jnp.concatenate([(ring + 1) % N, ring])
    edge_index = jnp.stack([src, dst], axis=0)

    a_hat = build_normalized_adjacency(edge_index, N)

    w1 = glorot(kw1, (input_dim, hidden_dim))
    b1 = jnp.zeros((hidden_dim,), jnp.float32)
    w2 = glorot(kw2, (hidden_dim, output_dim))
    b2 = jnp.zeros((output_dim,), jnp.float32)

    out = my_gcn_forward(x, a_hat, w1, b1, w2, b2)
    out = jax.block_until_ready(out)

    # Reference in plain JAX with the same bf16-operand / f32-accumulate recipe.
    a_bf = a_hat.astype(jnp.bfloat16)
    x_bf = x.astype(jnp.bfloat16)
    w1_bf = w1.astype(jnp.bfloat16)
    w2_bf = w2.astype(jnp.bfloat16)
    xw1 = jnp.dot(x_bf, w1_bf, preferred_element_type=jnp.float32).astype(jnp.bfloat16)
    h_ref = jnp.maximum(jnp.dot(a_bf, xw1, preferred_element_type=jnp.float32)
                        + b1[None, :], 0.0).astype(jnp.bfloat16)
    hw2 = jnp.dot(h_ref, w2_bf, preferred_element_type=jnp.float32).astype(jnp.bfloat16)
    z_ref = jnp.dot(a_bf, hw2, preferred_element_type=jnp.float32) + b2[None, :]
    ref = jax.nn.log_softmax(z_ref, axis=1)

    assert out.shape == (N, output_dim)
    assert jnp.all(jnp.isfinite(out))
    assert jnp.allclose(out, ref, atol=3e-2, rtol=3e-2), "mismatch vs JAX reference"

    print("KERNEL_OK")
</pallas_src>

<mosaic_0001>
module attributes {stable_mosaic.version = 11 : i64} {
  func.func @_xw_kernel(%arg0: i32, %arg1: i32, %arg2: memref<128x128xbf16, #tpu.memory_space<vmem>>, %arg3: memref<128x128xbf16, #tpu.memory_space<vmem>>, %arg4: memref<128x128xbf16, #tpu.memory_space<vmem>>, %arg5: memref<128x128xf32, #tpu.memory_space<vmem>>) attributes {dimension_semantics = [#tpu.dimension_semantics<parallel>, #tpu.dimension_semantics<arbitrary>], iteration_bounds = array<i64: 1, 1>, scalar_prefetch = 0 : i64, scratch_operands = 1 : i64, tpu.core_type = #tpu.core_type<tc>, window_params = [{transform_indices = @transform_0, window_bounds = array<i64: 128, 128>}, {transform_indices = @transform_1, window_bounds = array<i64: 128, 128>}, {transform_indices = @transform_2, window_bounds = array<i64: 128, 128>}]} {
    %c0_i32 = arith.constant 0 : i32
    %0 = arith.cmpi eq, %arg1, %c0_i32 : i32
    %1 = arith.extui %0 : i1 to i32
    %c0_i32_0 = arith.constant 0 : i32
    %2 = arith.cmpi ne, %1, %c0_i32_0 : i32
    scf.if %2 {
      %cst_10 = arith.constant 0.000000e+00 : f32
      %12 = vector.broadcast %cst_10 : f32 to vector<128x128xf32>
      %c0_11 = arith.constant 0 : index
      %c0_12 = arith.constant 0 : index
      %13 = vector.load %arg5[%c0_11, %c0_12] : memref<128x128xf32, #tpu.memory_space<vmem>>, vector<128x128xf32>
      tpu.vector_store %arg5[%c0_11, %c0_12], %12 {strides = array<i32>} : memref<128x128xf32, #tpu.memory_space<vmem>>, vector<128x128xf32>,
    } else {
    }
    %c0 = arith.constant 0 : index
    %c0_1 = arith.constant 0 : index
    %3 = vector.load %arg5[%c0, %c0_1] : memref<128x128xf32, #tpu.memory_space<vmem>>, vector<128x128xf32>
    %c0_2 = arith.constant 0 : index
    %c0_3 = arith.constant 0 : index
    %4 = vector.load %arg2[%c0_2, %c0_3] : memref<128x128xbf16, #tpu.memory_space<vmem>>, vector<128x128xbf16>
    %c0_4 = arith.constant 0 : index
    %c0_5 = arith.constant 0 : index
    %5 = vector.load %arg3[%c0_4, %c0_5] : memref<128x128xbf16, #tpu.memory_space<vmem>>, vector<128x128xbf16>
    %cst = arith.constant dense<0.000000e+00> : vector<128x128xf32>
    %6 = tpu.matmul %4, %5, %cst {dimension_numbers = #tpu.dot_dimension_numbers<[1], [0], [0], [1], [0, 0, 1, 1], [], []>} : vector<128x128xbf16>, vector<128x128xbf16>, vector<128x128xf32> -> vector<128x128xf32>
    %7 = arith.addf %3, %6 : vector<128x128xf32>
    %c0_6 = arith.constant 0 : index
    %c0_7 = arith.constant 0 : index
    %8 = vector.load %arg5[%c0_6, %c0_7] : memref<128x128xf32, #tpu.memory_space<vmem>>, vector<128x128xf32>
    tpu.vector_store %arg5[%c0_6, %c0_7], %7 {strides = array<i32>} : memref<128x128xf32, #tpu.memory_space<vmem>>, vector<128x128xf32>,
    %c0_i32_8 = arith.constant 0 : i32
    %9 = arith.cmpi eq, %arg1, %c0_i32_8 : i32
    %10 = arith.extui %9 : i1 to i32
    %c0_i32_9 = arith.constant 0 : i32
    %11 = arith.cmpi ne, %10, %c0_i32_9 : i32
    scf.if %11 {
      %c0_10 = arith.constant 0 : index
      %c0_11 = arith.constant 0 : index
      %12 = vector.load %arg5[%c0_10, %c0_11] : memref<128x128xf32, #tpu.memory_space<vmem>>, vector<128x128xf32>
      %13 = arith.truncf %12 : vector<128x128xf32> to vector<128x128xbf16>
      %c0_12 = arith.constant 0 : index
      %c0_13 = arith.constant 0 : index
      %14 = vector.load %arg4[%c0_12, %c0_13] : memref<128x128xbf16, #tpu.memory_space<vmem>>, vector<128x128xbf16>
      tpu.vector_store %arg4[%c0_12, %c0_13], %13 {strides = array<i32>} : memref<128x128xbf16, #tpu.memory_space<vmem>>, vector<128x128xbf16>,
    } else {
    }
    return
  }
  func.func @transform_0(%arg0: i32, %arg1: i32) -> (i32, i32) {
    %c0_i32 = arith.constant 0 : i32
    return %arg0, %arg1 : i32, i32
  }
  func.func @transform_1(%arg0: i32, %arg1: i32) -> (i32, i32) {
    %c0_i32 = arith.constant 0 : i32
    %c0_i32_0 = arith.constant 0 : i32
    return %arg1, %c0_i32 : i32, i32
  }
  func.func @transform_2(%arg0: i32, %arg1: i32) -> (i32, i32) {
    %c0_i32 = arith.constant 0 : i32
    %c0_i32_0 = arith.constant 0 : i32
    return %arg0, %c0_i32 : i32, i32
  }
}

</mosaic_0001>

<bundles_post_ra>
// kernel: tpu_custom_call.1
= control target key start
LH: loop header
LB: loop body
LE: loop exit
PB: predicated region body
PF: predicated region fallthrough
CT: control target
= control target key end

     0   :  { %7 = vsyncpa [#allocation4], 0  ;;  %s768_s0 = inlined_call_operand.hbm [shape: bf16[128,128], index: 0, kind: input, shape index: {}]   ;;  %s769_s1 = inlined_call_operand.hbm [shape: bf16[128,128], index: 1, kind: input, shape index: {}]   ;;  %s770_s2 = inlined_call_operand.hbm [shape: bf16[128,128], index: 2, kind: output, shape index: {}]  }
   0x1   :  { %8 = vsyncpa [#allocation7], 0 }
   0x2   :  { %9 = vsyncpa [#allocation5], 0  ;;  %s703_s9 = smov [#allocation3]   ;;  %s631_s13 = scalar_lea.hbm %s768_s0, 1024 }
   0x3   :  { %s15_s10 = sshll.u32 %s703_s9, 4  ;;  %p632_p0 = scmp.ne.s32.totalorder %s768_s0, %s631_s13  ;;  %s16_s10 = int_to_ptr.vmem [resolvable:$true] %s15_s10 }
   0x4   :  { %p635_p1 = scmp.lt.u32.totalorder %s631_s13, %s768_s0 }
   0x6   :  { %p637_p2 = pnand %p635_p1, %p632_p0 }
   0x8   :  { %640 = shalt.err (!%p637_p2)
}
   0x9   :  { %s641_s18 = scalar_lea.vmem %s16_s10, 1024  ;;  %p646_p4 = scmp.lt.s32.totalorder %s16_s10, %s16_s10 }
   0xa   :  { %p642_p3 = scmp.ne.s32.totalorder %s16_s10, %s641_s18  ;;  %p647_p5 = scmp.lt.s32.totalorder %s641_s18, %s641_s18 }
   0xc   :  { %p648_p6 = por %p647_p5, %p646_p4 }
   0xe   :  { %p649_p7 = pnand %p648_p6, %p642_p3 }
  0x10   :  { %652 = shalt.err (!%p649_p7)
}
  0x11   :  { %s704_s19 = smov 64   ;;  %s705_s20 = smov 4  }
  0x12   :  { %21 = dma.hbm_to_vmem [thread:$0]  %s768_s0, 1024, %s16_s10, [#allocation4], %s704_s19, %s704_s19, %s705_s20  }
  0x13   :  { %s706_s23 = smov [#allocation6]   ;;  %s653_s27 = scalar_lea.hbm %s769_s1, 1024 }
  0x14   :  { %s27_s24 = sshll.u32 %s706_s23, 4  ;;  %p654_p8 = scmp.ne.s32.totalorder %s769_s1, %s653_s27  ;;  %s28_s24 = int_to_ptr.vmem [resolvable:$true] %s27_s24 }
  0x15   :  { %p657_p9 = scmp.lt.u32.totalorder %s653_s27, %s769_s1 }
  0x17   :  { %p659_p10 = pnand %p657_p9, %p654_p8 }
  0x19   :  { %662 = shalt.err (!%p659_p10)
}
  0x1a   :  { %s663_s4 = scalar_lea.vmem %s28_s24, 1024  ;;  %p668_p12 = scmp.lt.s32.totalorder %s28_s24, %s28_s24 }
  0x1b   :  { %p664_p11 = scmp.ne.s32.totalorder %s28_s24, %s663_s4  ;;  %p669_p13 = scmp.lt.s32.totalorder %s663_s4, %s663_s4 }
  0x1d   :  { %p670_p0 = por %p669_p13, %p668_p12 }
  0x1f   :  { %p671_p1 = pnand %p670_p0, %p664_p11 }
  0x21   :  { %674 = shalt.err (!%p671_p1)
}
  0x22   :  { %33 = dma.hbm_to_vmem [thread:$0]  %s769_s1, 1024, %s28_s24, [#allocation7], %s704_s19, %s704_s19, %s705_s20  }
  0x23   :  { %697 = dma.done.wait [#allocation4], 1024  }
  0x24   :  { %698 = vsyncadd [#allocation4], 4294966272 }
  0x25   :  { %699 = dma.done.wait [#allocation7], 1024  }
  0x26   :  { %700 = vsyncadd [#allocation7], 4294966272  ;;  %v615_v0 = vld [vmem:[#allocation6] sm:$0xff]   ;;  %v616_v1 = vld [vmem:[#allocation6 + $0x8] sm:$0xff]   ;;  %s707_s1 = smov [#allocation8]  }
  0x27   :  { %562 = vmatprep.subr.bf16.mxu0 %v615_v0  ;;  %594 = vmatprep.subr.bf16.mxu1 %v615_v0  ;;  %v617_v2 = vld [vmem:[#allocation6 + $0x10] sm:$0xff]   ;;  %v618_v3 = vld [vmem:[#allocation6 + $0x18] sm:$0xff]   ;;  %v623_v4 = vld [vmem:[#allocation3] sm:$0xff]   ;;  %s438_s6 = sshll.u32 %s707_s1, 4  ;;  %s439_s6 = int_to_ptr.vmem [resolvable:$true] %s438_s6 }
  0x28   :  { %563 = vmatpush3.bf16.msra.mxu0 %v615_v0  ;;  %602 = vmatpush3.bf16.msra.mxu1 %v615_v0  ;;  %v624_v5 = vld [vmem:[#allocation3 + $0x20] sm:$0xff]   ;;  %v620_v7 = vld [vmem:[#allocation6 + $0x28] sm:$0xff]   ;;  %v621_v8 = vld [vmem:[#allocation6 + $0x30] sm:$0xff]   ;;  %s675_s7 = scalar_lea.vmem %s439_s6, 1024  ;;  %p680_p3 = scmp.lt.s32.totalorder %s439_s6, %s439_s6 }
  0x29   :  { %564 = vmatprep.subr.bf16.mxu0 %v616_v1  ;;  %595 = vmatprep.subr.bf16.mxu1 %v616_v1  ;;  %v619_v6 = vld [vmem:[#allocation6 + $0x20] sm:$0xff]   ;;  %v622_v9 = vld [vmem:[#allocation6 + $0x38] sm:$0xff]   ;;  %v625_v10 = vld [vmem:[#allocation3 + $0x8] sm:$0xff]   ;;  %p676_p2 = scmp.ne.s32.totalorder %s439_s6, %s675_s7  ;;  %p681_p4 = scmp.lt.s32.totalorder %s675_s7, %s675_s7 }
  0x2a   :  { %578 = vmatprep.mubr.bf16.mxu0 %v623_v4  ;;  %586 = vmatprep.mubr.bf16.mxu1 %v624_v5  ;;  %v626_v11 = vld [vmem:[#allocation3 + $0x28] sm:$0xff]   ;;  %v627_v12 = vld [vmem:[#allocation3 + $0x10] sm:$0xff]   ;;  %v629_v14 = vld [vmem:[#allocation3 + $0x18] sm:$0xff]  }
  0x2b   :  { %v628_v13 = vld [vmem:[#allocation3 + $0x30] sm:$0xff]   ;;  %v630_v15 = vld [vmem:[#allocation3 + $0x38] sm:$0xff]   ;;  %p682_p5 = por %p681_p4, %p680_p3 }
  0x2c   :  { %565 = vmatpush3.bf16.msra.mxu0 %v616_v1  ;;  %603 = vmatpush3.bf16.msra.mxu1 %v616_v1 }
  0x2d   :  { %566 = vmatprep.subr.bf16.mxu0 %v617_v2  ;;  %596 = vmatprep.subr.bf16.mxu1 %v617_v2  ;;  %p683_p6 = pnand %p682_p5, %p676_p2 }
  0x30   :  { %567 = vmatpush3.bf16.msra.mxu0 %v617_v2  ;;  %604 = vmatpush3.bf16.msra.mxu1 %v617_v2 }
  0x31   :  { %568 = vmatprep.subr.bf16.mxu0 %v618_v3  ;;  %597 = vmatprep.subr.bf16.mxu1 %v618_v3 }
  0x34   :  { %569 = vmatpush3.bf16.msra.mxu0 %v618_v3  ;;  %605 = vmatpush3.bf16.msra.mxu1 %v618_v3 }
  0x35   :  { %570 = vmatprep.subr.bf16.mxu0 %v619_v6  ;;  %598 = vmatprep.subr.bf16.mxu1 %v619_v6 }
  0x38   :  { %571 = vmatpush3.bf16.msra.mxu0 %v619_v6  ;;  %606 = vmatpush3.bf16.msra.mxu1 %v619_v6 }
  0x39   :  { %572 = vmatprep.subr.bf16.mxu0 %v620_v7  ;;  %599 = vmatprep.subr.bf16.mxu1 %v620_v7 }
  0x3c   :  { %573 = vmatpush3.bf16.msra.mxu0 %v620_v7  ;;  %607 = vmatpush3.bf16.msra.mxu1 %v620_v7 }
  0x3d   :  { %574 = vmatprep.subr.bf16.mxu0 %v621_v8  ;;  %600 = vmatprep.subr.bf16.mxu1 %v621_v8 }
  0x40   :  { %575 = vmatpush3.bf16.msra.mxu0 %v621_v8  ;;  %608 = vmatpush3.bf16.msra.mxu1 %v621_v8 }
  0x41   :  { %576 = vmatprep.subr.bf16.mxu0 %v622_v9  ;;  %601 = vmatprep.subr.bf16.mxu1 %v622_v9 }
  0x44   :  { %577 = vmatpush3.bf16.msra.mxu0 %v622_v9  ;;  %609 = vmatpush3.bf16.msra.mxu1 %v622_v9 }
  0x47   :  { %579 = vmatmul.mubr.bf16.vlgmr.msra.gmra.mrb[0].mxu0 %v625_v10  ;;  %587 = vmatmul.mubr.bf16.vlgmr.msra.gmra.mrb[0].mxu1 %v626_v11 }
  0x48   :  { %582 = vmatprep.mubr.bf16.mxu0 %v627_v12  ;;  %590 = vmatprep.mubr.bf16.mxu1 %v628_v13 }
  0x4f   :  { %583 = vmatmul.mubr.bf16.gmra.mrb[4].mxu0 %v629_v14  ;;  %591 = vmatmul.mubr.bf16.gmra.mrb[4].mxu1 %v630_v15 }
 0x11a   :  { %v580_v16 = vpop.f32.mrb[0].mxu0  ;;  %v588_v17 = vpop.f32.mrb[0].mxu1 }
 0x11b   :  { %v239_v18 = vpop.f32.mrb[1].mxu0  ;;  %v271_v19 = vpop.f32.mrb[1].mxu1 }
 0x11c   :  { %v581_v20 = vpop.f32.mrb[2].mxu0  ;;  %v589_v21 = vpop.f32.mrb[2].mxu1 }
 0x11d   :  { %v507_v22 = vpack.c.bf16 %v581_v20, %v580_v16  ;;  %v527_v23 = vpack.c.bf16 %v589_v21, %v588_v17  ;;  %v242_v24 = vpop.f32.mrb[3].mxu0  ;;  %v274_v25 = vpop.f32.mrb[3].mxu1 }
 0x11e   :  { %v502_v26 = vpack.c.bf16 %v242_v24, %v239_v18  ;;  %v522_v27 = vpack.c.bf16 %v274_v25, %v271_v19 }
 0x11f   :  { %539 = vst [vmem:[#allocation8 + $0x8] sm:$0xff] %v507_v22   ;;  %543 = vst [vmem:[#allocation8 + $0x28] sm:$0xff] %v527_v23  }
 0x120   :  { %503 = vst [vmem:[#allocation8] sm:$0xff] %v502_v26   ;;  %542 = vst [vmem:[#allocation8 + $0x20] sm:$0xff] %v522_v27  }
 0x122   :  { %v584_v28 = vpop.f32.mrb[4].mxu0  ;;  %v592_v29 = vpop.f32.mrb[4].mxu1 }
 0x123   :  { %v255_v30 = vpop.f32.mrb[5].mxu0  ;;  %v287_v31 = vpop.f32.mrb[5].mxu1 }
 0x124   :  { %v585_v32 = vpop.f32.mrb[6].mxu0  ;;  %v593_v33 = vpop.f32.mrb[6].mxu1 }
 0x125   :  { %v517_v34 = vpack.c.bf16 %v585_v32, %v584_v28  ;;  %v537_v35 = vpack.c.bf16 %v593_v33, %v592_v29  ;;  %v258_v36 = vpop.f32.mrb[7].mxu0  ;;  %v290_v37 = vpop.f32.mrb[7].mxu1 }
 0x126   :  { %v512_v38 = vpack.c.bf16 %v258_v36, %v255_v30  ;;  %v532_v39 = vpack.c.bf16 %v290_v37, %v287_v31 }
 0x127   :  { %541 = vst [vmem:[#allocation8 + $0x18] sm:$0xff] %v517_v34   ;;  %545 = vst [vmem:[#allocation8 + $0x38] sm:$0xff] %v537_v35  }
 0x128   :  { %540 = vst [vmem:[#allocation8 + $0x10] sm:$0xff] %v512_v38   ;;  %544 = vst [vmem:[#allocation8 + $0x30] sm:$0xff] %v532_v39  }
 0x129   :  { %686 = shalt.err (!%p683_p6)
}
 0x12a   :  { %s687_s10 = scalar_lea.hbm %s770_s2, 1024 }
 0x12b   :  { %p688_p7 = scmp.ne.s32.totalorder %s770_s2, %s687_s10  ;;  %p691_p8 = scmp.lt.u32.totalorder %s687_s10, %s770_s2 }
 0x12d   :  { %p693_p9 = pnand %p691_p8, %p688_p7 }
 0x12f   :  { %696 = shalt.err (!%p693_p9)
}
 0x130   :  { %444 = dma.vmem_to_hbm [thread:$0]  %s439_s6, 1024, %s770_s2, [#allocation5], %s704_s19, %s704_s19, %s705_s20  }
 0x131   :  { %701 = dma.done.wait [#allocation5], 1024  }
 0x132   :  { %702 = vsyncadd [#allocation5], 4294966272 }
 0x133   :  { %448 = vsyncpa [#allocation4], 1 }
 0x134   :  { %449 = vsyncpa [#allocation7], 1 }
 0x135   :  { %450 = vsyncpa [#allocation5], 1 }

</bundles_post_ra>
